<compile_context>
chip_gen: v7x
topology: tpu7x:2x2x1
jax: 0.10.0
libtpu: 0.0.40
codegen_flags: <defaults>
</compile_context>

<pallas_src>
import functools

import jax
import jax.numpy as jnp
from jax.experimental import pallas as pl
from jax.experimental.pallas import tpu as pltpu


def _round_up(x, m):
    return ((x + m - 1) // m) * m


def _chip_defaults():
    """Per-generation tile targets and VMEM budgets (conservative on unknown chips)."""
    kind = ""
    try:
        kind = jax.devices()[0].device_kind.lower()
    except Exception:
        pass
    if "v5 lite" in kind or "v5e" in kind or "v5litepod" in kind:
        # 4x128x128 MXU, 1 vst slot -> small tb, lane-wide tn.
        return dict(block_b=128, block_d=1024, vmem_budget=20 << 20, vmem_limit=64 << 20)
    if "v6" in kind or "trillium" in kind:
        # 2x256x256 MXU, 128 MiB VMEM -> big tiles, raised scoped limit.
        return dict(block_b=512, block_d=4096, vmem_budget=60 << 20, vmem_limit=100 << 20)
    # v7x (64 MiB physical VMEM / TC) or unknown: stay conservative.
    return dict(block_b=256, block_d=2048, vmem_budget=24 << 20, vmem_limit=48 << 20)


def _pick_n_tile(d_pad, target):
    """Largest multiple of 128 that divides d_pad (itself a multiple of 128), <= target."""
    best = 128
    t = 128
    lim = min(target, d_pad)
    while t <= lim:
        if d_pad % t == 0:
            best = t
        t += 128
    return best


def prepare_decoder_params(weight, bias, compute_dtype=jnp.bfloat16):
    """Hoisted, once-per-model parameter prep.

    weight: (output_dim, latent_dim) PyTorch nn.Linear layout.
    bias:   (output_dim,)
    Returns (weight_t_c, bias2d, output_dim) with weight transposed to (L, D_pad),
    cast to compute_dtype, and D padded to a lane-dense multiple of 128.
    """
    D, L = weight.shape
    d_pad = _round_up(D, 128)
    w_t = jnp.asarray(weight).T.astype(compute_dtype)          # (L, D)
    b2d = jnp.asarray(bias).reshape(1, D).astype(jnp.float32)  # (1, D)
    if d_pad != D:
        w_t = jnp.pad(w_t, ((0, 0), (0, d_pad - D)))
        b2d = jnp.pad(b2d, ((0, 0), (0, d_pad - D)))
    return w_t, b2d, D


def _decoder_kernel(z_ref, w_ref, b_ref, o_ref, *, approx):
    # MXU matmul with f32 accumulation (inputs may be bf16).
    acc = jnp.dot(z_ref[...], w_ref[...], preferred_element_type=jnp.float32)  # (tb, tn)
    acc = acc + b_ref[...]  # f32 bias broadcast over batch rows
    e = jnp.exp(-acc)       # EUP
    if approx:
        # EUP vrcp: ~1e-3 relative error, keeps the divide off the 4 VALU slots.
        o_ref[...] = pl.reciprocal(1.0 + e, approx=True).astype(o_ref.dtype)
    else:
        o_ref[...] = (1.0 / (1.0 + e)).astype(o_ref.dtype)


def dummy_decoder_forward(
    z,
    params,
    *,
    out_dtype=jnp.float32,     # bf16 halves writeback bytes on v7x if f32 isn't needed
    approx_sigmoid=True,
    use_pallas=None,           # None -> auto (small shapes fall back to fused XLA)
    block_b=None,
    block_d=None,
):
    """z: (B, L); params from prepare_decoder_params(). Returns sigmoid(z @ W.T + b)."""
    w_c, bias2d, D = params
    B, L = z.shape
    d_pad = w_c.shape[1]
    compute_dtype = w_c.dtype

    # ---- small-shape escape hatch: a (1,1)-grid kernel is pure launch overhead.
    approx_bytes = (B * L + L * d_pad + B * d_pad) * 4
    if use_pallas is None:
        use_pallas = approx_bytes >= (256 << 10)
    if not use_pallas:
        logits = z.astype(jnp.float32) @ w_c.astype(jnp.float32)[:, :D] + bias2d[0, :D]
        return jax.nn.sigmoid(logits).astype(out_dtype)

    cfg = _chip_defaults()
    block_b = cfg["block_b"] if block_b is None else block_b
    block_d = cfg["block_d"] if block_d is None else block_d

    # ---- batch tiling (multiple of 16 for bf16 sublane packing; pad, slice off later)
    tb = min(block_b, _round_up(B, 16))
    b_pad = _round_up(B, tb)
    z_c = z.astype(compute_dtype)
    if b_pad != B:
        z_c = jnp.pad(z_c, ((0, b_pad - B), (0, 0)))

    # ---- output-dim tiling: VMEM-budgeted (double-buffered weight + out + z + bias)
    in_sz = jnp.dtype(compute_dtype).itemsize
    out_sz = jnp.dtype(out_dtype).itemsize
    budget = cfg["vmem_budget"] - 2 * tb * L * in_sz
    per_tn = 2 * L * in_sz + 2 * tb * out_sz + 2 * 4
    max_tn = max(128, (budget // per_tn) // 128 * 128)
    tn = _pick_n_tile(d_pad, min(block_d, max_tn))

    # ---- cost estimate for the post-swap traffic pattern
    grid = (d_pad // tn, b_pad // tb)  # j (output tiles) OUTER, i (batch tiles) INNER
    bytes_accessed = (
        L * d_pad * in_sz                     # weight: streamed once
        + grid[0] * b_pad * L * in_sz         # z: re-fetched once per output tile column
        + d_pad * 4                           # bias
        + b_pad * d_pad * out_sz              # output writeback
    )
    cost = pl.CostEstimate(
        flops=2 * b_pad * L * d_pad,
        transcendentals=2 * b_pad * d_pad,    # exp + approx reciprocal per element
        bytes_accessed=bytes_accessed,
    )

    out = pl.pallas_call(
        functools.partial(_decoder_kernel, approx=approx_sigmoid),
        out_shape=jax.ShapeDtypeStruct((b_pad, d_pad), out_dtype),
        grid=grid,
        in_specs=[
            # weight index (0, j) is constant across the inner batch axis -> no re-DMA.
            pl.BlockSpec((tb, L), lambda j, i: (i, 0)),   # z tile: varies with batch
            pl.BlockSpec((L, tn), lambda j, i: (0, j)),   # weight tile: varies with D
            pl.BlockSpec((1, tn), lambda j, i: (0, j)),   # bias tile: varies with D
        ],
        out_specs=pl.BlockSpec((tb, tn), lambda j, i: (i, j)),
        compiler_params=pltpu.CompilerParams(
            dimension_semantics=("parallel", "parallel"),  # megacore-shardable
            vmem_limit_bytes=cfg["vmem_limit"],
        ),
        cost_estimate=cost,
    )(z_c, w_c, bias2d)

    if b_pad != B or d_pad != D:
        out = out[:B, :D]
    return out


if __name__ == "__main__":
    # Small shapes consistent with the module's forward: z last dim = latent_dim.
    batch = 8
    latent_dim = 32
    output_dim = 128

    key = jax.random.PRNGKey(0)
    k_z, k_w, k_b = jax.random.split(key, 3)

    # Deterministic parameter init mimicking nn.Linear default:
    # U(-1/sqrt(fan_in), 1/sqrt(fan_in)) with fan_in = latent_dim.
    bound = 1.0 / (latent_dim ** 0.5)
    weight = jax.random.uniform(
        k_w, (output_dim, latent_dim), jnp.float32, -bound, bound
    )  # PyTorch layout (out_features, in_features)
    bias = jax.random.uniform(k_b, (output_dim,), jnp.float32, -bound, bound)
    z = jax.random.normal(k_z, (batch, latent_dim), jnp.float32)

    # Plain-JAX f32 reference.
    ref = jax.nn.sigmoid(z @ weight.T + bias)

    # bf16 matmul inputs / f32 accumulation; force the Pallas path at demo shapes.
    params_bf16 = prepare_decoder_params(weight, bias, compute_dtype=jnp.bfloat16)
    out_bf16 = jax.block_until_ready(
        dummy_decoder_forward(z, params_bf16, use_pallas=True)
    )
    assert out_bf16.shape == (batch, output_dim)
    assert out_bf16.dtype == jnp.float32
    assert jnp.allclose(out_bf16, ref, atol=2e-2), "bf16 Pallas path mismatch"

    # Full-f32 inputs and exact sigmoid (tight tolerance).
    params_f32 = prepare_decoder_params(weight, bias, compute_dtype=jnp.float32)
    out_f32 = jax.block_until_ready(
        dummy_decoder_forward(z, params_f32, use_pallas=True, approx_sigmoid=False)
    )
    assert jnp.allclose(out_f32, ref, atol=1e-5), "f32 Pallas path mismatch"

    # Auto dispatch: demo shapes take the fused-XLA escape hatch; must still match.
    out_auto = jax.block_until_ready(dummy_decoder_forward(z, params_bf16))
    assert jnp.allclose(out_auto, ref, atol=2e-2), "auto/fallback path mismatch"

    print("KERNEL_OK")
</pallas_src>

<mosaic_0001>
module attributes {stable_mosaic.version = 11 : i64} {
  func.func @_decoder_kernel(%arg0: i32, %arg1: i32, %arg2: memref<16x32xbf16, #tpu.memory_space<vmem>>, %arg3: memref<32x128xbf16, #tpu.memory_space<vmem>>, %arg4: memref<1x128xf32, #tpu.memory_space<vmem>>, %arg5: memref<16x128xf32, #tpu.memory_space<vmem>>) attributes {dimension_semantics = [#tpu.dimension_semantics<parallel>, #tpu.dimension_semantics<parallel>], iteration_bounds = array<i64: 1, 1>, scalar_prefetch = 0 : i64, scratch_operands = 0 : i64, tpu.core_type = #tpu.core_type<tc>, window_params = [{transform_indices = @transform_0, window_bounds = array<i64: 16, 32>}, {transform_indices = @transform_1, window_bounds = array<i64: 32, 128>}, {transform_indices = @transform_2, window_bounds = array<i64: 1, 128>}, {transform_indices = @transform_3, window_bounds = array<i64: 16, 128>}]} {
    %c0 = arith.constant 0 : index
    %c0_0 = arith.constant 0 : index
    %0 = vector.load %arg2[%c0, %c0_0] : memref<16x32xbf16, #tpu.memory_space<vmem>>, vector<16x32xbf16>
    %c0_1 = arith.constant 0 : index
    %c0_2 = arith.constant 0 : index
    %1 = vector.load %arg3[%c0_1, %c0_2] : memref<32x128xbf16, #tpu.memory_space<vmem>>, vector<32x128xbf16>
    %cst = arith.constant dense<0.000000e+00> : vector<16x128xf32>
    %2 = tpu.matmul %0, %1, %cst {dimension_numbers = #tpu.dot_dimension_numbers<[1], [0], [0], [1], [0, 0, 1, 1], [], []>} : vector<16x32xbf16>, vector<32x128xbf16>, vector<16x128xf32> -> vector<16x128xf32>
    %c0_3 = arith.constant 0 : index
    %c0_4 = arith.constant 0 : index
    %3 = vector.load %arg4[%c0_3, %c0_4] : memref<1x128xf32, #tpu.memory_space<vmem>>, vector<1x128xf32>
    %4 = vector.broadcast %3 : vector<1x128xf32> to vector<16x128xf32>
    %5 = arith.addf %2, %4 : vector<16x128xf32>
    %cst_5 = arith.constant 0.000000e+00 : f32
    %6 = vector.broadcast %cst_5 : f32 to vector<16x128xf32>
    %7 = arith.subf %6, %5 : vector<16x128xf32>
    %8 = math.exp %7 : vector<16x128xf32>
    %cst_6 = arith.constant 1.000000e+00 : f32
    %9 = vector.broadcast %cst_6 : f32 to vector<16x128xf32>
    %10 = arith.addf %9, %8 : vector<16x128xf32>
    %11 = tpu.reciprocal %10 {approx = true} : vector<16x128xf32> -> vector<16x128xf32>
    %c0_7 = arith.constant 0 : index
    %c0_8 = arith.constant 0 : index
    %12 = vector.load %arg5[%c0_7, %c0_8] : memref<16x128xf32, #tpu.memory_space<vmem>>, vector<16x128xf32>
    tpu.vector_store %arg5[%c0_7, %c0_8], %11 {strides = array<i32>} : memref<16x128xf32, #tpu.memory_space<vmem>>, vector<16x128xf32>,
    return
  }
  func.func @transform_0(%arg0: i32, %arg1: i32) -> (i32, i32) {
    %c0_i32 = arith.constant 0 : i32
    %c0_i32_0 = arith.constant 0 : i32
    return %arg1, %c0_i32 : i32, i32
  }
  func.func @transform_1(%arg0: i32, %arg1: i32) -> (i32, i32) {
    %c0_i32 = arith.constant 0 : i32
    %c0_i32_0 = arith.constant 0 : i32
    return %c0_i32, %arg0 : i32, i32
  }
  func.func @transform_2(%arg0: i32, %arg1: i32) -> (i32, i32) {
    %c0_i32 = arith.constant 0 : i32
    %c0_i32_0 = arith.constant 0 : i32
    return %c0_i32, %arg0 : i32, i32
  }
  func.func @transform_3(%arg0: i32, %arg1: i32) -> (i32, i32) {
    %c0_i32 = arith.constant 0 : i32
    return %arg1, %arg0 : i32, i32
  }
}

</mosaic_0001>

<bundles_post_ra>
// kernel: tpu_custom_call.1
= control target key start
LH: loop header
LB: loop body
LE: loop exit
PB: predicated region body
PF: predicated region fallthrough
CT: control target
= control target key end

     0   :  { %8 = vsyncpa [#allocation3], 0  ;;  %s325_s0 = inlined_call_operand.hbm [shape: bf16[16,32], index: 0, kind: input, shape index: {}]   ;;  %s326_s1 = inlined_call_operand.hbm [shape: bf16[32,128], index: 1, kind: input, shape index: {}]   ;;  %s327_s2 = inlined_call_operand.vmem [shape: f32[1,128], index: 2, kind: input, shape index: {}]   ;;  %s328_s3 = inlined_call_operand.hbm [shape: f32[16,128], index: 3, kind: output, shape index: {}]  }
   0x1   :  { %9 = vsyncpa [#allocation6], 0 }
   0x2   :  { %10 = vsyncpa [#allocation4], 0  ;;  %s257_s12 = smov [#allocation2]   ;;  %s185_s16 = scalar_lea.hbm %s325_s0, 128 }
   0x3   :  { %s16_s13 = sshll.u32 %s257_s12, 4  ;;  %p186_p0 = scmp.ne.s32.totalorder %s325_s0, %s185_s16  ;;  %s17_s13 = int_to_ptr.vmem [resolvable:$true] %s16_s13 }
   0x4   :  { %p189_p1 = scmp.lt.u32.totalorder %s185_s16, %s325_s0 }
   0x6   :  { %p191_p2 = pnand %p189_p1, %p186_p0 }
   0x8   :  { %194 = shalt.err (!%p191_p2)
}
   0x9   :  { %s195_s21 = scalar_lea.vmem %s17_s13, 128  ;;  %p200_p4 = scmp.lt.s32.totalorder %s17_s13, %s17_s13 }
   0xa   :  { %p196_p3 = scmp.ne.s32.totalorder %s17_s13, %s195_s21  ;;  %p201_p5 = scmp.lt.s32.totalorder %s195_s21, %s195_s21 }
   0xc   :  { %p202_p6 = por %p201_p5, %p200_p4 }
   0xe   :  { %p203_p7 = pnand %p202_p6, %p196_p3 }
  0x10   :  { %206 = shalt.err (!%p203_p7)
}
  0x11   :  { %s258_s22 = smov 64   ;;  %s259_s23 = smov 4  }
  0x12   :  { %22 = dma.hbm_to_vmem [thread:$0]  %s325_s0, 128, %s17_s13, [#allocation3], %s258_s22, %s258_s22, %s259_s23  }
  0x13   :  { %s260_s26 = smov [#allocation5]   ;;  %s207_s30 = scalar_lea.hbm %s326_s1, 256 }
  0x14   :  { %s28_s27 = sshll.u32 %s260_s26, 4  ;;  %p208_p8 = scmp.ne.s32.totalorder %s326_s1, %s207_s30  ;;  %s29_s27 = int_to_ptr.vmem [resolvable:$true] %s28_s27 }
  0x15   :  { %p211_p9 = scmp.lt.u32.totalorder %s207_s30, %s326_s1 }
  0x17   :  { %p213_p10 = pnand %p211_p9, %p208_p8 }
  0x19   :  { %216 = shalt.err (!%p213_p10)
}
  0x1a   :  { %s217_s8 = scalar_lea.vmem %s29_s27, 256  ;;  %p222_p12 = scmp.lt.s32.totalorder %s29_s27, %s29_s27 }
  0x1b   :  { %p218_p11 = scmp.ne.s32.totalorder %s29_s27, %s217_s8  ;;  %p223_p13 = scmp.lt.s32.totalorder %s217_s8, %s217_s8 }
  0x1d   :  { %p224_p0 = por %p223_p13, %p222_p12 }
  0x1f   :  { %p225_p1 = pnand %p224_p0, %p218_p11 }
  0x21   :  { %228 = shalt.err (!%p225_p1)
}
  0x22   :  { %34 = dma.hbm_to_vmem [thread:$0]  %s326_s1, 256, %s29_s27, [#allocation6], %s258_s22, %s258_s22, %s259_s23  }
  0x23   :  { %251 = dma.done.wait [#allocation3], 128  }
  0x24   :  { %252 = vsyncadd [#allocation3], 4294967168 }
  0x25   :  { %253 = dma.done.wait [#allocation6], 256  }
  0x26   :  { %254 = vsyncadd [#allocation6], 4294967040  ;;  %v261_v0 = vmov 0.0   ;;  %vm262_vm0 = vmmov 0   ;;  %v174_v1 = vld [vmem:[#allocation5] sm:$0xff]   ;;  %v175_v2 = vld [vmem:[#allocation5 + $0x8] sm:$0xff]  }
  0x27   :  { %157 = vmatprep.subr.bf16.mxu0 %v261_v0  ;;  %161 = vmatprep.mubr.msk.bf16.mxu0 %vm262_vm0, %v261_v0  ;;  %v176_v3 = vld [vmem:[#allocation2] sm:$0xff]   ;;  %vm74_vm1 = vcmask 261120   ;;  %s263_s1 = smov [#allocation7]  }
  0x28   :  { %158 = vmatpush3.bf16.msra.mxu0 %v174_v1  ;;  %v149_v4 = vld [vmem:[%s327_s2] ss:$0 sm:$0xff]  ;;  %s136_s2 = sshll.u32 %s263_s1, 4  ;;  %s137_s2 = int_to_ptr.vmem [resolvable:$true] %s136_s2 }
  0x29   :  { %159 = vmatprep.subr.bf16.mxu0 %v261_v0  ;;  %s229_s12 = scalar_lea.vmem %s137_s2, 256  ;;  %p234_p3 = scmp.lt.s32.totalorder %s137_s2, %s137_s2 }
  0x2a   :  { %p230_p2 = scmp.ne.s32.totalorder %s137_s2, %s229_s12  ;;  %p235_p4 = scmp.lt.s32.totalorder %s229_s12, %s229_s12 }
  0x2c   :  { %160 = vmatpush3.bf16.msra.mxu0 %v175_v2  ;;  %p236_p5 = por %p235_p4, %p234_p3 }
  0x2e   :  { %p237_p6 = pnand %p236_p5, %p230_p2 }
  0x2f   :  { %162 = vmatmul.mubr.msk.bf16.vlgmr.msra.gmra.mrb[0].mxu0 %vm74_vm1, %v176_v3 }
 0x102   :  { %v112_v5 = vpop.f32.mrb[0].mxu0 }
 0x103   :  { %v113_v6 = vadd.f32 %v149_v4, %v112_v5  ;;  %v163_v7 = vpop.f32.mrb[1].mxu0 }
 0x104   :  { %v115_v8 = vpop.f32.mrb[2].mxu0 }
 0x105   :  { %v119_v9 = vsub.f32 0.0, %v113_v6  ;;  %v116_v10 = vadd.f32 %v149_v4, %v115_v8  ;;  %v164_v11 = vpop.f32.mrb[3].mxu0 }
 0x107   :  { %v121_v12 = vmul.f32 1.442695, %v119_v9  ;;  %v120_v13 = vsub.f32 0.0, %v116_v10 }
 0x109   :  { %177 = vpow2.f32 %v121_v12  ;;  %v123_v14 = vmul.f32 1.442695, %v120_v13 }
 0x10b   :  { %179 = vpow2.f32 %v123_v14 }
 0x113   :  { %v178_v15 = vpop.eup %177 }
 0x114   :  { %v125_v16 = vadd.f32 1.0, %v178_v15 }
 0x115   :  { %v180_v17 = vpop.eup %179 }
 0x116   :  { %181 = vrcp.f32 %v125_v16  ;;  %v126_v18 = vadd.f32 1.0, %v180_v17 }
 0x118   :  { %183 = vrcp.f32 %v126_v18 }
 0x120   :  { %v182_v19 = vpop.eup %181 }
 0x121   :  { %129 = vst [vmem:[#allocation7] sm:$0xff] %v182_v19 }
 0x122   :  { %v184_v20 = vpop.eup %183 }
 0x123   :  { %130 = vst [vmem:[#allocation7 + $0x8] sm:$0xff] %v184_v20 }
 0x124   :  { %240 = shalt.err (!%p237_p6)
}
 0x125   :  { %s241_s15 = scalar_lea.hbm %s328_s3, 256 }
 0x126   :  { %p242_p7 = scmp.ne.s32.totalorder %s328_s3, %s241_s15  ;;  %p245_p8 = scmp.lt.u32.totalorder %s241_s15, %s328_s3 }
 0x128   :  { %p247_p9 = pnand %p245_p8, %p242_p7 }
 0x12a   :  { %250 = shalt.err (!%p247_p9)
}
 0x12b   :  { %s264_s20 = smov 128   ;;  %s265_s21 = smov 8  }
 0x12c   :  { %142 = dma.vmem_to_hbm [thread:$0]  %s137_s2, 256, %s328_s3, [#allocation4], %s264_s20, %s264_s20, %s265_s21  }
 0x12d   :  { %255 = dma.done.wait [#allocation4], 256  }
 0x12e   :  { %256 = vsyncadd [#allocation4], 4294967040 }
 0x12f   :  { %146 = vsyncpa [#allocation3], 1 }
 0x130   :  { %147 = vsyncpa [#allocation6], 1 }
 0x131   :  { %148 = vsyncpa [#allocation4], 1 }

</bundles_post_ra>
